<compile_context>
chip_gen: v7x
topology: tpu7x:2x2x1
jax: 0.10.0
libtpu: 0.0.40
codegen_flags: <defaults>
</compile_context>

<pallas_src>
import functools

import jax
import jax.numpy as jnp
from jax import lax
from jax.experimental import pallas as pl
from jax.experimental.pallas import tpu as pltpu


def _round_up(x, m):
    return ((x + m - 1) // m) * m


def _conv_bn_relu_kernel(x_ref, w_ref, scale_ref, bias_ref, out_ref, *,
                         tm, kh, wq):
    """One (TM, C_out_pad) output tile = sum_i X[rows + i*wq] @ W[i], BN, ReLU.

    x_ref     : (M_in, Kp)            resident W-unrolled padded input rows
    w_ref     : (KH, Kp, C_out_pad)   resident conv weights, one slab per KH tap
    scale_ref : (1, C_out_pad)        folded BN scale
    bias_ref  : (1, C_out_pad)        folded BN bias
    out_ref   : (TM, C_out_pad)       lane-dense (128-multiple) output tile
    """
    m = pl.program_id(0)
    base = m * tm
    acc = jnp.zeros(out_ref.shape, jnp.float32)
    for i in range(kh):  # static unrolled loop over kernel-row taps
        # tm and wq are both multiples of 8 -> sublane-aligned dynamic start.
        start = pl.multiple_of(base + i * wq, 8)
        lhs = x_ref[pl.ds(start, tm), :]                       # (TM, Kp)
        acc = acc + jnp.dot(lhs, w_ref[i],
                            preferred_element_type=jnp.float32)
    y = acc * scale_ref[...] + bias_ref[...]                   # f32 epilogue
    out_ref[...] = jnp.maximum(y, 0.0).astype(out_ref.dtype)


def _pick_tm(m_rows):
    # Per-grid-step overhead is ~0.35us; bigger tiles amortize it (measured
    # mem-bound tiling: 128 -> ~29% of HBM roofline, 512 -> ~85%).  Keep at
    # least 2 grid steps when possible so v7x megacore can split the M axis.
    if m_rows >= 8 * 512:
        return 512
    if m_rows >= 2 * 256:
        return 256
    return 128


@functools.partial(
    jax.jit,
    static_argnames=("stride", "padding", "eps", "nchw_output",
                     "operand_dtype"))
def basic_conv2d(x, weight, gamma, beta, running_mean, running_var,
                 *, stride=1, padding=1, eps=1e-3, nchw_output=True,
                 operand_dtype=jnp.float32):
    """x: (N, C_in, H, W) NCHW.  weight: (C_out, C_in, KH, KW) (PyTorch OIHW)."""
    n, c_in, h, w = x.shape
    c_out, c_in_w, kh, kw = weight.shape
    assert c_in_w == c_in
    s = int(stride)
    assert s >= 1
    p = int(padding)

    # Stride-1 geometry (stride > 1 is handled by subsampling afterwards).
    # TODO(synk): a dedicated strided fast path would avoid the s*s extra work.
    hp = h + 2 * p
    wp0 = w + 2 * p
    ho1 = hp - kh + 1
    wo1 = wp0 - kw + 1

    # NCHW -> NHWC + spatial zero-pad (single small layout pass).
    x_nhwc = jnp.transpose(x, (0, 2, 3, 1)).astype(operand_dtype)
    xp = jnp.pad(x_nhwc, ((0, 0), (p, p), (p, p), (0, 0)))

    # Partially unroll the KW taps into the channel dim:
    #   a[n, h, w, j*C:(j+1)*C] = xp[n, h, w+j, :]
    # so the remaining KH taps become pure row shifts of a flattened
    # (N*Hp*Wq, KW*C) matrix -- no KH*KW im2col matrix ever hits HBM.
    wq = _round_up(wp0, 8)                     # flattened row length, mult of 8
    xpe = jnp.pad(xp, ((0, 0), (0, 0), (0, wq + kw - 1 - wp0), (0, 0)))
    a = jnp.concatenate([xpe[:, :, j:j + wq, :] for j in range(kw)], axis=-1)

    k2 = kw * c_in
    k2p = _round_up(k2, 8)                     # sublane-aligned K
    m_full = n * hp * wq
    a = a.reshape(m_full, k2)
    if k2p != k2:
        a = jnp.pad(a, ((0, 0), (0, k2p - k2)))

    tm = _pick_tm(m_full)
    mg = pl.cdiv(m_full, tm)
    m_out = mg * tm
    m_in = _round_up(m_out + (kh - 1) * wq, 8)  # shifted reads stay in-bounds
    a = jnp.pad(a, ((0, m_in - m_full), (0, 0)))

    # Conv weights: OIHW -> (KH, KW*C_in, C_out), lane-pad C_out to 128.
    c_out_p = _round_up(c_out, 128)
    w_taps = jnp.transpose(weight, (2, 3, 1, 0)).reshape(kh, k2, c_out)
    w_taps = jnp.pad(w_taps, ((0, 0), (0, k2p - k2), (0, c_out_p - c_out)))
    w_taps = w_taps.astype(operand_dtype)

    # Eval-mode BN folded into per-channel scale / bias (kept f32).
    inv_std = lax.rsqrt(running_var.astype(jnp.float32) + eps)
    scale = gamma.astype(jnp.float32) * inv_std
    bias = beta.astype(jnp.float32) - running_mean.astype(jnp.float32) * scale
    scale = jnp.pad(scale, (0, c_out_p - c_out)).reshape(1, c_out_p)
    bias = jnp.pad(bias, (0, c_out_p - c_out)).reshape(1, c_out_p)

    # Rough VMEM estimate (lane-rounded f32 words, x2 pipeline buffers) so the
    # scoped limit is explicit; capped well under v7x's 64 MiB physical VMEM.
    est = 4 * (2 * m_in * max(k2p, 128)
               + 2 * kh * max(k2p, 8) * c_out_p
               + 2 * tm * c_out_p
               + 4 * c_out_p)
    vmem_limit = int(min(max(2 * est, 32 * 2 ** 20), 48 * 2 ** 20))

    kernel = functools.partial(_conv_bn_relu_kernel, tm=tm, kh=kh, wq=wq)
    out = pl.pallas_call(
        kernel,
        out_shape=jax.ShapeDtypeStruct((m_out, c_out_p), jnp.float32),
        grid_spec=pltpu.PrefetchScalarGridSpec(
            num_scalar_prefetch=0,
            grid=(mg,),
            in_specs=[
                # Whole W-unrolled input resident in VMEM: constant block index
                # => DMA'd from HBM exactly once across the grid.
                # TODO(synk): halo-tiled row blocks + manual DMA for
                # activations too large to stay resident in VMEM.
                pl.BlockSpec((m_in, k2p), lambda i: (0, 0)),
                # Constant-index operands below never change across the grid;
                # they are fetched once (their second pipeline buffer is idle,
                # negligible at these sizes).
                pl.BlockSpec((kh, k2p, c_out_p), lambda i: (0, 0, 0)),
                pl.BlockSpec((1, c_out_p), lambda i: (0, 0)),
                pl.BlockSpec((1, c_out_p), lambda i: (0, 0)),
            ],
            out_specs=pl.BlockSpec((tm, c_out_p), lambda i: (i, 0)),
        ),
        compiler_params=pltpu.CompilerParams(
            dimension_semantics=("parallel",),
            vmem_limit_bytes=vmem_limit),
    )(a, w_taps, scale, bias)

    # Un-flatten, drop padded rows/lanes, restore requested layout.
    out = out[:m_full].reshape(n, hp, wq, c_out_p)[:, :ho1, :wo1, :c_out]
    if s != 1:
        out = out[:, ::s, ::s, :]
    if nchw_output:
        # PyTorch-layout output; pass nchw_output=False to keep NHWC and skip
        # this extra HBM pass when chaining blocks.
        out = jnp.transpose(out, (0, 3, 1, 2))
    return out


def _reference(x, weight, gamma, beta, running_mean, running_var,
               stride=1, padding=1, eps=1e-3):
    y = lax.conv_general_dilated(
        x, weight, window_strides=(stride, stride),
        padding=[(padding, padding), (padding, padding)],
        dimension_numbers=("NCHW", "OIHW", "NCHW"))
    inv_std = lax.rsqrt(running_var + eps)
    scale = (gamma * inv_std)[None, :, None, None]
    bias = (beta - running_mean * gamma * inv_std)[None, :, None, None]
    return jnp.maximum(y * scale + bias, 0.0)


if __name__ == "__main__":
    key = jax.random.PRNGKey(0)
    k_x, k_w, k_g, k_b = jax.random.split(key, 4)

    # BasicConv2d(in_channels=4, out_channels=8, kernel_size=3, padding=1)
    N, C_IN, H, W = 2, 4, 16, 16
    C_OUT, KH, KW = 8, 3, 3

    x = jax.random.normal(k_x, (N, C_IN, H, W), dtype=jnp.float32)
    weight = 0.1 * jax.random.normal(k_w, (C_OUT, C_IN, KH, KW), dtype=jnp.float32)
    gamma = 1.0 + 0.1 * jax.random.normal(k_g, (C_OUT,), dtype=jnp.float32)
    beta = 0.1 * jax.random.normal(k_b, (C_OUT,), dtype=jnp.float32)
    running_mean = jnp.zeros((C_OUT,), dtype=jnp.float32)  # fresh BatchNorm2d
    running_var = jnp.ones((C_OUT,), dtype=jnp.float32)

    # stride=1, padding=1 (the standard BasicConv2d config).
    out = basic_conv2d(x, weight, gamma, beta, running_mean, running_var,
                       stride=1, padding=1)
    out = jax.block_until_ready(out)
    ref = _reference(x, weight, gamma, beta, running_mean, running_var,
                     stride=1, padding=1)
    assert out.shape == (N, C_OUT, H, W), out.shape
    assert jnp.allclose(out, ref, atol=1e-4, rtol=1e-4), \
        float(jnp.max(jnp.abs(out - ref)))

    # stride=2 semantics preserved (via subsampling fallback).
    out2 = basic_conv2d(x, weight, gamma, beta, running_mean, running_var,
                        stride=2, padding=1)
    out2 = jax.block_until_ready(out2)
    ref2 = _reference(x, weight, gamma, beta, running_mean, running_var,
                      stride=2, padding=1)
    assert out2.shape == ref2.shape, (out2.shape, ref2.shape)
    assert jnp.allclose(out2, ref2, atol=1e-4, rtol=1e-4), \
        float(jnp.max(jnp.abs(out2 - ref2)))

    print("KERNEL_OK")
</pallas_src>

<mosaic_0001>
module attributes {stable_mosaic.version = 11 : i64} {
  func.func @_conv_bn_relu_kernel(%arg0: i32, %arg1: memref<1072x16xf32, #tpu.memory_space<vmem>>, %arg2: memref<3x16x128xf32, #tpu.memory_space<vmem>>, %arg3: memref<1x128xf32, #tpu.memory_space<vmem>>, %arg4: memref<1x128xf32, #tpu.memory_space<vmem>>, %arg5: memref<256x128xf32, #tpu.memory_space<vmem>>) attributes {dimension_semantics = [#tpu.dimension_semantics<parallel>], iteration_bounds = array<i64: 4>, scalar_prefetch = 0 : i64, scratch_operands = 0 : i64, tpu.core_type = #tpu.core_type<tc>, window_params = [{pipeline_mode = #tpu.pipeline_mode<synchronous>, transform_indices = @transform_0, window_bounds = array<i64: 1072, 16>}, {pipeline_mode = #tpu.pipeline_mode<synchronous>, transform_indices = @transform_1, window_bounds = array<i64: 3, 16, 128>}, {pipeline_mode = #tpu.pipeline_mode<synchronous>, transform_indices = @transform_2, window_bounds = array<i64: 1, 128>}, {pipeline_mode = #tpu.pipeline_mode<synchronous>, transform_indices = @transform_3, window_bounds = array<i64: 1, 128>}, {transform_indices = @transform_4, window_bounds = array<i64: 256, 128>}]} {
    %c256_i32 = arith.constant 256 : i32
    %0 = arith.muli %arg0, %c256_i32 : i32
    %cst = arith.constant 0.000000e+00 : f32
    %1 = vector.broadcast %cst : f32 to vector<256x128xf32>
    %c0_i32 = arith.constant 0 : i32
    %2 = arith.addi %0, %c0_i32 : i32
    %3 = tpu.assume_multiple %2, 8 : i32
    %4 = arith.index_cast %3 : i32 to index
    %c0 = arith.constant 0 : index
    %5 = vector.load %arg1[%4, %c0] : memref<1072x16xf32, #tpu.memory_space<vmem>>, vector<256x16xf32>
    %c0_0 = arith.constant 0 : index
    %c0_1 = arith.constant 0 : index
    %c0_2 = arith.constant 0 : index
    %6 = vector.load %arg2[%c0_0, %c0_1, %c0_2] : memref<3x16x128xf32, #tpu.memory_space<vmem>>, vector<1x16x128xf32>
    %7 = vector.shape_cast %6 : vector<1x16x128xf32> to vector<16x128xf32>
    %cst_3 = arith.constant dense<0.000000e+00> : vector<256x128xf32>
    %8 = tpu.matmul %5, %7, %cst_3 {dimension_numbers = #tpu.dot_dimension_numbers<[1], [0], [0], [1], [0, 0, 1, 1], [], []>} : vector<256x16xf32>, vector<16x128xf32>, vector<256x128xf32> -> vector<256x128xf32>
    %9 = arith.addf %1, %8 : vector<256x128xf32>
    %c24_i32 = arith.constant 24 : i32
    %10 = arith.addi %0, %c24_i32 : i32
    %11 = tpu.assume_multiple %10, 8 : i32
    %12 = arith.index_cast %11 : i32 to index
    %c0_4 = arith.constant 0 : index
    %13 = vector.load %arg1[%12, %c0_4] : memref<1072x16xf32, #tpu.memory_space<vmem>>, vector<256x16xf32>
    %c1 = arith.constant 1 : index
    %c0_5 = arith.constant 0 : index
    %c0_6 = arith.constant 0 : index
    %14 = vector.load %arg2[%c1, %c0_5, %c0_6] : memref<3x16x128xf32, #tpu.memory_space<vmem>>, vector<1x16x128xf32>
    %15 = vector.shape_cast %14 : vector<1x16x128xf32> to vector<16x128xf32>
    %cst_7 = arith.constant dense<0.000000e+00> : vector<256x128xf32>
    %16 = tpu.matmul %13, %15, %cst_7 {dimension_numbers = #tpu.dot_dimension_numbers<[1], [0], [0], [1], [0, 0, 1, 1], [], []>} : vector<256x16xf32>, vector<16x128xf32>, vector<256x128xf32> -> vector<256x128xf32>
    %17 = arith.addf %9, %16 : vector<256x128xf32>
    %c48_i32 = arith.constant 48 : i32
    %18 = arith.addi %0, %c48_i32 : i32
    %19 = tpu.assume_multiple %18, 8 : i32
    %20 = arith.index_cast %19 : i32 to index
    %c0_8 = arith.constant 0 : index
    %21 = vector.load %arg1[%20, %c0_8] : memref<1072x16xf32, #tpu.memory_space<vmem>>, vector<256x16xf32>
    %c2 = arith.constant 2 : index
    %c0_9 = arith.constant 0 : index
    %c0_10 = arith.constant 0 : index
    %22 = vector.load %arg2[%c2, %c0_9, %c0_10] : memref<3x16x128xf32, #tpu.memory_space<vmem>>, vector<1x16x128xf32>
    %23 = vector.shape_cast %22 : vector<1x16x128xf32> to vector<16x128xf32>
    %cst_11 = arith.constant dense<0.000000e+00> : vector<256x128xf32>
    %24 = tpu.matmul %21, %23, %cst_11 {dimension_numbers = #tpu.dot_dimension_numbers<[1], [0], [0], [1], [0, 0, 1, 1], [], []>} : vector<256x16xf32>, vector<16x128xf32>, vector<256x128xf32> -> vector<256x128xf32>
    %25 = arith.addf %17, %24 : vector<256x128xf32>
    %c0_12 = arith.constant 0 : index
    %c0_13 = arith.constant 0 : index
    %26 = vector.load %arg3[%c0_12, %c0_13] : memref<1x128xf32, #tpu.memory_space<vmem>>, vector<1x128xf32>
    %27 = vector.broadcast %26 : vector<1x128xf32> to vector<256x128xf32>
    %28 = arith.mulf %25, %27 : vector<256x128xf32>
    %c0_14 = arith.constant 0 : index
    %c0_15 = arith.constant 0 : index
    %29 = vector.load %arg4[%c0_14, %c0_15] : memref<1x128xf32, #tpu.memory_space<vmem>>, vector<1x128xf32>
    %30 = vector.broadcast %29 : vector<1x128xf32> to vector<256x128xf32>
    %31 = arith.addf %28, %30 : vector<256x128xf32>
    %cst_16 = arith.constant 0.000000e+00 : f32
    %32 = vector.broadcast %cst_16 : f32 to vector<256x128xf32>
    %33 = arith.maximumf %31, %32 : vector<256x128xf32>
    %c0_17 = arith.constant 0 : index
    %c0_18 = arith.constant 0 : index
    %34 = vector.load %arg5[%c0_17, %c0_18] : memref<256x128xf32, #tpu.memory_space<vmem>>, vector<256x128xf32>
    tpu.vector_store %arg5[%c0_17, %c0_18], %33 {strides = array<i32>} : memref<256x128xf32, #tpu.memory_space<vmem>>, vector<256x128xf32>,
    return
  }
  func.func @transform_0(%arg0: i32) -> (i32, i32) {
    %c0_i32 = arith.constant 0 : i32
    %c0_i32_0 = arith.constant 0 : i32
    %c0_i32_1 = arith.constant 0 : i32
    return %c0_i32, %c0_i32_0 : i32, i32
  }
  func.func @transform_1(%arg0: i32) -> (i32, i32, i32) {
    %c0_i32 = arith.constant 0 : i32
    %c0_i32_0 = arith.constant 0 : i32
    %c0_i32_1 = arith.constant 0 : i32
    %c0_i32_2 = arith.constant 0 : i32
    return %c0_i32, %c0_i32_0, %c0_i32_1 : i32, i32, i32
  }
  func.func @transform_2(%arg0: i32) -> (i32, i32) {
    %c0_i32 = arith.constant 0 : i32
    %c0_i32_0 = arith.constant 0 : i32
    %c0_i32_1 = arith.constant 0 : i32
    return %c0_i32, %c0_i32_0 : i32, i32
  }
  func.func @transform_3(%arg0: i32) -> (i32, i32) {
    %c0_i32 = arith.constant 0 : i32
    %c0_i32_0 = arith.constant 0 : i32
    %c0_i32_1 = arith.constant 0 : i32
    return %c0_i32, %c0_i32_0 : i32, i32
  }
  func.func @transform_4(%arg0: i32) -> (i32, i32) {
    %c0_i32 = arith.constant 0 : i32
    %c0_i32_0 = arith.constant 0 : i32
    return %arg0, %c0_i32 : i32, i32
  }
}

</mosaic_0001>

<bundles_post_ra>
// kernel: basic_conv2d.1
= control target key start
LH: loop header
LB: loop body
LE: loop exit
PB: predicated region body
PF: predicated region fallthrough
CT: control target
= control target key end

     0   :  { %s2033_s15 = smov 0   ;;  %s2334_s0 = inlined_call_operand.vmem [shape: f32[1072,16], index: 0, kind: input, shape index: {}]   ;;  %s2335_s1 = inlined_call_operand.vmem [shape: f32[3,16,128], index: 1, kind: input, shape index: {}]   ;;  %s2336_s2 = inlined_call_operand.vmem [shape: f32[1,128], index: 2, kind: input, shape index: {}]   ;;  %s2337_s3 = inlined_call_operand.vmem [shape: f32[1,128], index: 3, kind: input, shape index: {}]   ;;  %s2338_s4 = inlined_call_operand.vmem [shape: f32[1024,128], index: 4, kind: output, shape index: {}]  }
   0x1 LB: > { %s1479_s16 = sadd.s32 4294967295, %s2006_s15   ;;  %p1482_p0 = scmp.ge.s32.totalorder %s2006_s15, 1  ;;  %s2006_s15 = sphi %s2033_s15, %s14_s15  }
   0x2   : > { %p152_p1 = scmp.lt.s32.totalorder %s2006_s15, 5 }
   0x4   : > { %p153_p2 = pnand %p1482_p0, %p152_p1 }
   0x5   : > { %v1519_v0 = vld [vmem:[%s2335_s1 + $0x10] sm:$0xff] (!%p153_p2)  ;;  %v1520_v1 = vld [vmem:[%s2335_s1 + $0x18] sm:$0xff] (!%p153_p2)  ;;  %v213_v2 = vld [vmem:[%s2335_s1] sm:$0xff] (!%p153_p2)  ;;  %s1485_s23 = sshll.u32 (!%p153_p2), %s1479_s16, 8  ;;  %vm252_vm0 = vcmask (!%p153_p2), 130048   ;;  %s1483_s7 = sshll.u32 (!%p153_p2), %s1479_s16, 5 }
   0x6   : > { %156 = sbr.rel (%p153_p2) target bundleno = 327 (0x147), region = 36  ;;  %v1914_v3 = vpack.c.bf16 (!%p153_p2), %v1520_v1, %v1519_v0  ;;  %v214_v4 = vld [vmem:[%s2335_s1 + $0x8] sm:$0xff] (!%p153_p2)  ;;  %s2058_s28 = scalar_lea.vmem (!%p153_p2), %s2334_s0, %s1485_s23  ;;  %v1618_v5 = vld [vmem:[%s2335_s1 + $0x20] sm:$0xff] (!%p153_p2) }
   0x7   : > { %v1619_v6 = vld [vmem:[%s2335_s1 + $0x28] sm:$0xff] (!%p153_p2)  ;;  %v1918_v7 = vpack.c.bf16 (!%p153_p2), %v214_v4, %v213_v2  ;;  %v1487_v8 = vld [vmem:[%s2058_s28 + $0x18] sm:$0xff] (!%p153_p2)  ;;  %v181_v9 = vld [vmem:[%s2058_s28] sm:$0xff] (!%p153_p2)  ;;  %p174_p3 = scmp.lt.s32.totalorder (!%p153_p2), %s1483_s7, 127 }
   0x8   : > { %v1922_v10 = vpack.c.bf16 (!%p153_p2), %v1619_v6, %v1618_v5  ;;  %1915 = vmatprep.subr.bf16.mxu1 (!%p153_p2), %v1914_v3  ;;  %1762 = vmatprep.mubr.msk.f32.mxu1 (!%p153_p2), %vm252_vm0, %v1487_v8  ;;  %v1488_v11 = vld [vmem:[%s2058_s28 + $0x20] sm:$0xff] (!%p153_p2)  ;;  %v182_v12 = vld [vmem:[%s2058_s28 + $0x8] sm:$0xff] (!%p153_p2)  ;;  %v183_v14 = vld [vmem:[%s2058_s28 + $0x10] sm:$0xff] (!%p153_p2) }
   0x9   : > { %1919 = vmatprep.subr.bf16.mxu0 (!%p153_p2), %v1918_v7  ;;  %1917 = vmatpush3.bf16.msra.mxu1 (!%p153_p2), %v1914_v3  ;;  %v1489_v13 = vld [vmem:[%s2058_s28 + $0x28] sm:$0xff] (!%p153_p2)  ;;  %v1490_v15 = vld [vmem:[%s2058_s28 + $0x30] sm:$0xff] (!%p153_p2)  ;;  %v1491_v16 = vld [vmem:[%s2058_s28 + $0x38] sm:$0xff] (!%p153_p2) }
   0xa   : > { %1921 = vmatpush3.bf16.msra.mxu0 (!%p153_p2), %v1918_v7  ;;  %1814 = vmatprep.mubr.msk.f32.mxu0 (!%p153_p2), %vm252_vm0, %v181_v9  ;;  %v1492_v17 = vld [vmem:[%s2058_s28 + $0x40] sm:$0xff] (!%p153_p2)  ;;  %v1493_v18 = vld [vmem:[%s2058_s28 + $0x48] sm:$0xff] (!%p153_p2)  ;;  %v1494_v19 = vld [vmem:[%s2058_s28 + $0x50] sm:$0xff] (!%p153_p2) }
   0xb   : > { %1926 = vmatprep.subr.bf16.mxu1 (!%p153_p2), %v1918_v7  ;;  %1923 = vmatprep.subr.bf16.mxu0 (!%p153_p2), %v1922_v10  ;;  %v1495_v20 = vld [vmem:[%s2058_s28 + $0x58] sm:$0xff] (!%p153_p2)  ;;  %v1496_v21 = vld [vmem:[%s2058_s28 + $0x60] sm:$0xff] (!%p153_p2)  ;;  %v1497_v22 = vld [vmem:[%s2058_s28 + $0x68] sm:$0xff] (!%p153_p2) }
   0xc   : > { %1763 = vmatmul.mubr.msk.f32.vlgmr.msra.gmra.mrb[0].mxu1 (!%p153_p2), %vm252_vm0, %v1488_v11  ;;  %v1498_v23 = vld [vmem:[%s2058_s28 + $0x70] sm:$0xff] (!%p153_p2)  ;;  %v1499_v24 = vld [vmem:[%s2058_s28 + $0x78] sm:$0xff] (!%p153_p2)  ;;  %v1500_v25 = vld [vmem:[%s2058_s28 + $0x80] sm:$0xff] (!%p153_p2) }
   0xd   : > { %1815 = vmatmul.mubr.msk.f32.vlgmr.msra.gmra.mrb[0].mxu0 %vm252_vm0, %v182_v12  ;;  %1927 = vmatpush3.bf16.msra.mxu1 %v1918_v7  ;;  %v1501_v26 = vld [vmem:[%s2058_s28 + $0x88] sm:$0xff]  ;;  %v1502_v27 = vld [vmem:[%s2058_s28 + $0x90] sm:$0xff]  ;;  %v1503_v28 = vld [vmem:[%s2058_s28 + $0x98] sm:$0xff]  ;;  %s2340_s7 = smov (!%p174_p3, %s1483_s7), 127 }
   0xe   : > { %1925 = vmatpush3.bf16.msra.mxu0 %v1922_v10  ;;  %1765 = vmatprep.mubr.msk.f32.mxu1 %vm252_vm0, %v1489_v13  ;;  %v1504_v29 = vld [vmem:[%s2058_s28 + $0xa0] sm:$0xff]  ;;  %v1505_v30 = vld [vmem:[%s2058_s28 + $0xa8] sm:$0xff]  ;;  %v1506_v31 = vld [vmem:[%s2058_s28 + $0xb0] sm:$0xff]  ;;  %s1484_s12 = sshll.u32 %s2340_s7, 3 }
   0xf   : > { %1817 = vmatprep.mubr.msk.f32.mxu0 %vm252_vm0, %v183_v14  ;;  %v1507_v32 = vld [vmem:[%s2058_s28 + $0xb8] sm:$0xff]  ;;  %v1508_v33 = vld [vmem:[%s2058_s28 + $0xc0] sm:$0xff]  ;;  %v1509_v34 = vld [vmem:[%s2058_s28 + $0xc8] sm:$0xff]  ;;  %s2230_s16 = scalar_lea.vmem %s2338_s4, %s1484_s12 }
  0x10   : > { %1766 = vmatmul.mubr.msk.f32.gmra.mrb[2].mxu1 %vm252_vm0, %v1490_v15  ;;  %v1510_v35 = vld [vmem:[%s2058_s28 + $0xd0] sm:$0xff]  ;;  %v1511_v36 = vld [vmem:[%s2058_s28 + $0xd8] sm:$0xff]  ;;  %v1512_v37 = vld [vmem:[%s2058_s28 + $0xe0] sm:$0xff] }
  0x11   : > { %1818 = vmatmul.mubr.msk.f32.gmra.mrb[2].mxu0 %vm252_vm0, %v1487_v8  ;;  %1768 = vmatprep.mubr.msk.f32.mxu1 %vm252_vm0, %v1491_v16  ;;  %v1513_v38 = vld [vmem:[%s2058_s28 + $0xe8] sm:$0xff]  ;;  %v1514_v39 = vld [vmem:[%s2058_s28 + $0xf0] sm:$0xff]  ;;  %v1515_v40 = vld [vmem:[%s2058_s28 + $0xf8] sm:$0xff] }
  0x12   : > { %1820 = vmatprep.mubr.msk.f32.mxu0 %vm252_vm0, %v1488_v11  ;;  %v1516_v41 = vld [vmem:[%s2058_s28 + $0x100] sm:$0xff]  ;;  %v1517_v42 = vld [vmem:[%s2058_s28 + $0x108] sm:$0xff]  ;;  %v1518_v43 = vld [vmem:[%s2058_s28 + $0x110] sm:$0xff] }
  0x13   : > { %v1615_v44 = vld [vmem:[%s2058_s28 + $0x118] sm:$0xff]  ;;  %v1616_v45 = vld [vmem:[%s2058_s28 + $0x120] sm:$0xff]  ;;  %v1617_v46 = vld [vmem:[%s2058_s28 + $0x128] sm:$0xff] }
  0x14   : > { %1769 = vmatmul.mubr.msk.f32.gmra.mrb[4].mxu1 %vm252_vm0, %v1492_v17  ;;  %v2217_v0 = vld [vmem:[%s2336_s2] ss:$0 sm:$0xff] }
  0x15   : > { %1821 = vmatmul.mubr.msk.f32.gmra.mrb[4].mxu0 %vm252_vm0, %v1489_v13  ;;  %1771 = vmatprep.mubr.msk.f32.mxu1 %vm252_vm0, %v1493_v18  ;;  %v2222_v3 = vld [vmem:[%s2337_s3] ss:$0 sm:$0xff] }
  0x16   : > { %1823 = vmatprep.mubr.msk.f32.mxu0 %vm252_vm0, %v1490_v15 }
  0x18   : > { %1772 = vmatmul.mubr.msk.f32.gmra.mrb[6].mxu1 %vm252_vm0, %v1494_v19 }
  0x19   : > { %1824 = vmatmul.mubr.msk.f32.gmra.mrb[6].mxu0 %vm252_vm0, %v1491_v16  ;;  %1774 = vmatprep.mubr.msk.f32.mxu1 %vm252_vm0, %v1495_v20 }
  0x1a   : > { %1826 = vmatprep.mubr.msk.f32.mxu0 %vm252_vm0, %v1492_v17 }
  0x1c   : > { %1775 = vmatmul.mubr.msk.f32.gmra.mrb[8].mxu1 %vm252_vm0, %v1496_v21 }
  0x1d   : > { %1827 = vmatmul.mubr.msk.f32.gmra.mrb[8].mxu0 %vm252_vm0, %v1493_v18  ;;  %1777 = vmatprep.mubr.msk.f32.mxu1 %vm252_vm0, %v1497_v22 }
  0x1e   : > { %1829 = vmatprep.mubr.msk.f32.mxu0 %vm252_vm0, %v1494_v19 }
  0x20   : > { %1778 = vmatmul.mubr.msk.f32.gmra.mrb[10].mxu1 %vm252_vm0, %v1498_v23 }
  0x21   : > { %1830 = vmatmul.mubr.msk.f32.gmra.mrb[10].mxu0 %vm252_vm0, %v1495_v20  ;;  %1780 = vmatprep.mubr.msk.f32.mxu1 %vm252_vm0, %v1499_v24 }
  0x22   : > { %1832 = vmatprep.mubr.msk.f32.mxu0 %vm252_vm0, %v1496_v21 }
  0x24   : > { %1781 = vmatmul.mubr.msk.f32.gmra.mrb[12].mxu1 %vm252_vm0, %v1500_v25 }
  0x25   : > { %1833 = vmatmul.mubr.msk.f32.gmra.mrb[12].mxu0 %vm252_vm0, %v1497_v22  ;;  %1783 = vmatprep.mubr.msk.f32.mxu1 %vm252_vm0, %v1501_v26 }
  0x26   : > { %1835 = vmatprep.mubr.msk.f32.mxu0 %vm252_vm0, %v1498_v23 }
  0x28   : > { %1784 = vmatmul.mubr.msk.f32.gmra.mrb[14].mxu1 %vm252_vm0, %v1502_v27 }
  0x29   : > { %1836 = vmatmul.mubr.msk.f32.gmra.mrb[14].mxu0 %vm252_vm0, %v1499_v24  ;;  %1786 = vmatprep.mubr.msk.f32.mxu1 %vm252_vm0, %v1503_v28 }
  0x2a   : > { %1866 = vmatprep.mubr.msk.f32.mxu0 %vm252_vm0, %v1490_v15 }
  0x2c   : > { %1787 = vmatmul.mubr.msk.f32.gmra.mrb[16].mxu1 %vm252_vm0, %v1504_v29 }
  0x2d   : > { %1867 = vmatmul.mubr.msk.f32.vlgmr.msra.gmra.mrb[0].mxu0 %vm252_vm0, %v1491_v16  ;;  %1789 = vmatprep.mubr.msk.f32.mxu1 %vm252_vm0, %v1505_v30 }
  0x2e   : > { %1869 = vmatprep.mubr.msk.f32.mxu0 %vm252_vm0, %v1492_v17 }
  0x30   : > { %1790 = vmatmul.mubr.msk.f32.gmra.mrb[18].mxu1 %vm252_vm0, %v1506_v31 }
  0x31   : > { %1870 = vmatmul.mubr.msk.f32.gmra.mrb[2].mxu0 %vm252_vm0, %v1493_v18  ;;  %1792 = vmatprep.mubr.msk.f32.mxu1 %vm252_vm0, %v1507_v32 }
  0x32   : > { %1872 = vmatprep.mubr.msk.f32.mxu0 %vm252_vm0, %v1494_v19 }
  0x34   : > { %1793 = vmatmul.mubr.msk.f32.gmra.mrb[20].mxu1 %vm252_vm0, %v1508_v33 }
  0x35   : > { %1873 = vmatmul.mubr.msk.f32.gmra.mrb[4].mxu0 %vm252_vm0, %v1495_v20  ;;  %1795 = vmatprep.mubr.msk.f32.mxu1 %vm252_vm0, %v1509_v34 }
  0x36   : > { %1875 = vmatprep.mubr.msk.f32.mxu0 %vm252_vm0, %v1496_v21 }
  0x38   : > { %1796 = vmatmul.mubr.msk.f32.gmra.mrb[22].mxu1 %vm252_vm0, %v1510_v35 }
  0x39   : > { %1876 = vmatmul.mubr.msk.f32.gmra.mrb[6].mxu0 %vm252_vm0, %v1497_v22  ;;  %1798 = vmatprep.mubr.msk.f32.mxu1 %vm252_vm0, %v1511_v36 }
  0x3a   : > { %1878 = vmatprep.mubr.msk.f32.mxu0 %vm252_vm0, %v1498_v23 }
  0x3c   : > { %1799 = vmatmul.mubr.msk.f32.gmra.mrb[24].mxu1 %vm252_vm0, %v1512_v37 }
  0x3d   : > { %1879 = vmatmul.mubr.msk.f32.gmra.mrb[8].mxu0 %vm252_vm0, %v1499_v24  ;;  %1801 = vmatprep.mubr.msk.f32.mxu1 %vm252_vm0, %v1513_v38 }
  0x3e   : > { %1881 = vmatprep.mubr.msk.f32.mxu0 %vm252_vm0, %v1500_v25 }
  0x40   : > { %1802 = vmatmul.mubr.msk.f32.gmra.mrb[26].mxu1 %vm252_vm0, %v1514_v39 }
  0x41   : > { %1882 = vmatmul.mubr.msk.f32.gmra.mrb[10].mxu0 %vm252_vm0, %v1501_v26  ;;  %1804 = vmatprep.mubr.msk.f32.mxu1 %vm252_vm0, %v1515_v40 }
  0x42   : > { %1884 = vmatprep.mubr.msk.f32.mxu0 %vm252_vm0, %v1502_v27 }
  0x44   : > { %1805 = vmatmul.mubr.msk.f32.gmra.mrb[28].mxu1 %vm252_vm0, %v1516_v41 }
  0x45   : > { %1885 = vmatmul.mubr.msk.f32.gmra.mrb[12].mxu0 %vm252_vm0, %v1503_v28  ;;  %1807 = vmatprep.mubr.msk.f32.mxu1 %vm252_vm0, %v1517_v42 }
  0x46   : > { %1887 = vmatprep.mubr.msk.f32.mxu0 %vm252_vm0, %v1504_v29 }
  0x48   : > { %1808 = vmatmul.mubr.msk.f32.gmra.mrb[30].mxu1 %vm252_vm0, %v1518_v43 }
  0x49   : > { %1888 = vmatmul.mubr.msk.f32.gmra.mrb[14].mxu0 %vm252_vm0, %v1505_v30  ;;  %1838 = vmatprep.mubr.msk.f32.mxu1 %vm252_vm0, %v1500_v25 }
  0x4a   : > { %1890 = vmatprep.mubr.msk.f32.mxu0 %vm252_vm0, %v1506_v31 }
  0x4c   : > { %1839 = vmatmul.mubr.msk.f32.vlgmr.msra.gmra.mrb[16].mxu1 %vm252_vm0, %v1501_v26 }
  0x4d   : > { %1891 = vmatmul.mubr.msk.f32.gmra.mrb[16].mxu0 %vm252_vm0, %v1507_v32  ;;  %1841 = vmatprep.mubr.msk.f32.mxu1 %vm252_vm0, %v1502_v27 }
  0x4e   : > { %1893 = vmatprep.mubr.msk.f32.mxu0 %vm252_vm0, %v1508_v33 }
  0x50   : > { %1842 = vmatmul.mubr.msk.f32.gmra.mrb[18].mxu1 %vm252_vm0, %v1503_v28 }
  0x51   : > { %1894 = vmatmul.mubr.msk.f32.gmra.mrb[18].mxu0 %vm252_vm0, %v1509_v34  ;;  %1844 = vmatprep.mubr.msk.f32.mxu1 %vm252_vm0, %v1504_v29 }
  0x52   : > { %1896 = vmatprep.mubr.msk.f32.mxu0 %vm252_vm0, %v1510_v35 }
  0x54   : > { %1845 = vmatmul.mubr.msk.f32.gmra.mrb[20].mxu1 %vm252_vm0, %v1505_v30 }
  0x55   : > { %1897 = vmatmul.mubr.msk.f32.gmra.mrb[20].mxu0 %vm252_vm0, %v1511_v36  ;;  %1847 = vmatprep.mubr.msk.f32.mxu1 %vm252_vm0, %v1506_v31 }
  0x56   : > { %1899 = vmatprep.mubr.msk.f32.mxu0 %vm252_vm0, %v1512_v37 }
  0x58   : > { %1848 = vmatmul.mubr.msk.f32.gmra.mrb[22].mxu1 %vm252_vm0, %v1507_v32 }
  0x59   : > { %1900 = vmatmul.mubr.msk.f32.gmra.mrb[22].mxu0 %vm252_vm0, %v1513_v38  ;;  %1850 = vmatprep.mubr.msk.f32.mxu1 %vm252_vm0, %v1508_v33 }
  0x5a   : > { %1902 = vmatprep.mubr.msk.f32.mxu0 %vm252_vm0, %v1514_v39 }
  0x5c   : > { %1851 = vmatmul.mubr.msk.f32.gmra.mrb[24].mxu1 %vm252_vm0, %v1509_v34 }
  0x5d   : > { %1903 = vmatmul.mubr.msk.f32.gmra.mrb[24].mxu0 %vm252_vm0, %v1515_v40  ;;  %1853 = vmatprep.mubr.msk.f32.mxu1 %vm252_vm0, %v1510_v35 }
  0x5e   : > { %1905 = vmatprep.mubr.msk.f32.mxu0 %vm252_vm0, %v1516_v41 }
  0x60   : > { %1854 = vmatmul.mubr.msk.f32.gmra.mrb[26].mxu1 %vm252_vm0, %v1511_v36 }
  0x61   : > { %1906 = vmatmul.mubr.msk.f32.gmra.mrb[26].mxu0 %vm252_vm0, %v1517_v42  ;;  %1856 = vmatprep.mubr.msk.f32.mxu1 %vm252_vm0, %v1512_v37 }
  0x62   : > { %1908 = vmatprep.mubr.msk.f32.mxu0 %vm252_vm0, %v1518_v43 }
  0x64   : > { %1857 = vmatmul.mubr.msk.f32.gmra.mrb[28].mxu1 %vm252_vm0, %v1513_v38 }
  0x65   : > { %1909 = vmatmul.mubr.msk.f32.gmra.mrb[28].mxu0 %vm252_vm0, %v1615_v44  ;;  %1859 = vmatprep.mubr.msk.f32.mxu1 %vm252_vm0, %v1514_v39 }
  0x66   : > { %1911 = vmatprep.mubr.msk.f32.mxu0 %vm252_vm0, %v1616_v45 }
  0x68   : > { %1860 = vmatmul.mubr.msk.f32.gmra.mrb[30].mxu1 %vm252_vm0, %v1515_v40 }
  0x69   : > { %1912 = vmatmul.mubr.msk.f32.gmra.mrb[30].mxu0 %vm252_vm0, %v1617_v46 }
  0xdf   : > { %v1764_v47 = vpop.f32.mrb[0].mxu1 }
  0xe0   : > { %v415_v48 = vpop.f32.mrb[1].mxu1 }
  0xe3   : > { %v1767_v49 = vpop.f32.mrb[2].mxu1 }
  0xe4   : > { %v425_v50 = vpop.f32.mrb[3].mxu1 }
  0xe7   : > { %v1770_v51 = vpop.f32.mrb[4].mxu1 }
  0xe8   : > { %v435_v52 = vpop.f32.mrb[5].mxu1 }
  0xeb   : > { %v1773_v53 = vpop.f32.mrb[6].mxu1 }
  0xec   : > { %v445_v54 = vpop.f32.mrb[7].mxu1 }
  0xef   : > { %v1776_v55 = vpop.f32.mrb[8].mxu1 }
  0xf0   : > { %v455_v56 = vpop.f32.mrb[9].mxu1 }
  0xf3   : > { %v2200_v57 = vpop.f32.mrb[10].mxu1 }
  0xf4   : > { %v2202_v58 = vpop.f32.mrb[11].mxu1 }
  0xf7   : > { %v2204_v59 = vpop.f32.mrb[12].mxu1 }
  0xf8   : > { %v2206_v60 = vpop.f32.mrb[13].mxu1 }
  0xfb   : > { %v2210_v61 = vpop.f32.mrb[14].mxu1 }
  0xfc   : > { %v2212_v62 = vpop.f32.mrb[15].mxu1 }
 0x100   : > { %v1868_v63 = vpop.f32.mrb[0].mxu0 }
 0x101   : > { %v1928_v1 = vadd.f32 %v1868_v63, %v1764_v47  ;;  %v1094_v2 = vpop.f32.mrb[1].mxu0 }
 0x102   : > { %v1929_v4 = vadd.f32 %v1094_v2, %v415_v48 }
 0x103   : > { %v1293_v5 = vmul.f32 %v1928_v1, %v2217_v0 }
 0x104   : > { %v1292_v6 = vmul.f32 %v1929_v4, %v2217_v0  ;;  %v1871_v7 = vpop.f32.mrb[2].mxu0 }
 0x105   : > { %v1332_v8 = vadd.f32 %v2222_v3, %v1293_v5  ;;  %v1930_v9 = vadd.f32 %v1871_v7, %v1767_v49  ;;  %v1104_v10 = vpop.f32.mrb[3].mxu0 }
 0x106   : > { %v1331_v11 = vadd.f32 %v2222_v3, %v1292_v6  ;;  %v1931_v12 = vadd.f32 %v1104_v10, %v425_v50 }
 0x107   : > { %v1364_v13 = vmax.f32 %v1332_v8, 0.0  ;;  %v1295_v14 = vmul.f32 %v1930_v9, %v2217_v0 }
 0x108   : > { %v1363_v15 = vmax.f32 %v1331_v11, 0.0  ;;  %v1294_v16 = vmul.f32 %v1931_v12, %v2217_v0  ;;  %v1874_v17 = vpop.f32.mrb[4].mxu0 }
 0x109   : > { %1396 = vst [vmem:[%s2230_s16 + $0x8] sm:$0xff] %v1364_v13  ;;  %v1334_v18 = vadd.f32 %v2222_v3, %v1295_v14  ;;  %v1932_v19 = vadd.f32 %v1874_v17, %v1770_v51  ;;  %v1114_v20 = vpop.f32.mrb[5].mxu0 }
 0x10a   : > { %1395 = vst [vmem:[%s2230_s16] sm:$0xff] %v1363_v15  ;;  %v1333_v21 = vadd.f32 %v2222_v3, %v1294_v16  ;;  %v1933_v22 = vadd.f32 %v1114_v20, %v435_v52 }
 0x10b   : > { %v1366_v23 = vmax.f32 %v1334_v18, 0.0  ;;  %v1297_v24 = vmul.f32 %v1932_v19, %v2217_v0 }
 0x10c   : > { %v1365_v25 = vmax.f32 %v1333_v21, 0.0  ;;  %v1296_v26 = vmul.f32 %v1933_v22, %v2217_v0  ;;  %v1877_v27 = vpop.f32.mrb[6].mxu0 }
 0x10d   : > { %1398 = vst [vmem:[%s2230_s16 + $0x18] sm:$0xff] %v1366_v23  ;;  %v1336_v28 = vadd.f32 %v2222_v3, %v1297_v24  ;;  %v1934_v29 = vadd.f32 %v1877_v27, %v1773_v53  ;;  %v1124_v30 = vpop.f32.mrb[7].mxu0 }
 0x10e   : > { %1397 = vst [vmem:[%s2230_s16 + $0x10] sm:$0xff] %v1365_v25  ;;  %v1335_v31 = vadd.f32 %v2222_v3, %v1296_v26  ;;  %v1935_v32 = vadd.f32 %v1124_v30, %v445_v54 }
 0x10f   : > { %v1368_v33 = vmax.f32 %v1336_v28, 0.0  ;;  %v1299_v34 = vmul.f32 %v1934_v29, %v2217_v0 }
 0x110   : > { %v1367_v35 = vmax.f32 %v1335_v31, 0.0  ;;  %v1298_v36 = vmul.f32 %v1935_v32, %v2217_v0  ;;  %v1880_v37 = vpop.f32.mrb[8].mxu0 }
 0x111   : > { %1400 = vst [vmem:[%s2230_s16 + $0x28] sm:$0xff] %v1368_v33  ;;  %v1338_v38 = vadd.f32 %v2222_v3, %v1299_v34  ;;  %v1936_v39 = vadd.f32 %v1880_v37, %v1776_v55  ;;  %v1134_v40 = vpop.f32.mrb[9].mxu0 }
 0x112   : > { %1399 = vst [vmem:[%s2230_s16 + $0x20] sm:$0xff] %v1367_v35  ;;  %v1337_v41 = vadd.f32 %v2222_v3, %v1298_v36  ;;  %v1937_v42 = vadd.f32 %v1134_v40, %v455_v56 }
 0x113   : > { %v1370_v43 = vmax.f32 %v1338_v38, 0.0  ;;  %v1301_v44 = vmul.f32 %v1936_v39, %v2217_v0 }
 0x114   : > { %v1369_v45 = vmax.f32 %v1337_v41, 0.0  ;;  %v1300_v46 = vmul.f32 %v1937_v42, %v2217_v0  ;;  %v1883_v47 = vpop.f32.mrb[10].mxu0 }
 0x115   : > { %1402 = vst [vmem:[%s2230_s16 + $0x38] sm:$0xff] %v1370_v43  ;;  %v1340_v48 = vadd.f32 %v2222_v3, %v1301_v44  ;;  %v1938_v49 = vadd.f32 %v1883_v47, %v2200_v57  ;;  %v1144_v50 = vpop.f32.mrb[11].mxu0 }
 0x116   : > { %1401 = vst [vmem:[%s2230_s16 + $0x30] sm:$0xff] %v1369_v45  ;;  %v1339_v51 = vadd.f32 %v2222_v3, %v1300_v46  ;;  %v1939_v52 = vadd.f32 %v1144_v50, %v2202_v58 }
 0x117   : > { %v1372_v53 = vmax.f32 %v1340_v48, 0.0  ;;  %v1303_v54 = vmul.f32 %v1938_v49, %v2217_v0 }
 0x118   : > { %v1371_v55 = vmax.f32 %v1339_v51, 0.0  ;;  %v1302_v56 = vmul.f32 %v1939_v52, %v2217_v0  ;;  %v1886_v63 = vpop.f32.mrb[12].mxu0 }
 0x119   : > { %1404 = vst [vmem:[%s2230_s16 + $0x48] sm:$0xff] %v1372_v53  ;;  %v1342_v1 = vadd.f32 %v2222_v3, %v1303_v54  ;;  %v1940_v57 = vadd.f32 %v1886_v63, %v2204_v59  ;;  %v1154_v2 = vpop.f32.mrb[13].mxu0 }
 0x11a   : > { %1403 = vst [vmem:[%s2230_s16 + $0x40] sm:$0xff] %v1371_v55  ;;  %v1341_v4 = vadd.f32 %v2222_v3, %v1302_v56  ;;  %v1941_v58 = vadd.f32 %v1154_v2, %v2206_v60 }
 0x11b   : > { %v1374_v5 = vmax.f32 %v1342_v1, 0.0  ;;  %v1305_v6 = vmul.f32 %v1940_v57, %v2217_v0 }
 0x11c   : > { %v1373_v7 = vmax.f32 %v1341_v4, 0.0  ;;  %v1304_v8 = vmul.f32 %v1941_v58, %v2217_v0  ;;  %v1889_v9 = vpop.f32.mrb[14].mxu0 }
 0x11d   : > { %1406 = vst [vmem:[%s2230_s16 + $0x58] sm:$0xff] %v1374_v5  ;;  %v1344_v10 = vadd.f32 %v2222_v3, %v1305_v6  ;;  %v1942_v11 = vadd.f32 %v1889_v9, %v2210_v61  ;;  %v1164_v59 = vpop.f32.mrb[15].mxu0 }
 0x11e   : > { %1405 = vst [vmem:[%s2230_s16 + $0x50] sm:$0xff] %v1373_v7  ;;  %v1343_v12 = vadd.f32 %v2222_v3, %v1304_v8  ;;  %v1943_v60 = vadd.f32 %v1164_v59, %v2212_v62 }
 0x11f   : > { %v1376_v13 = vmax.f32 %v1344_v10, 0.0  ;;  %v1307_v14 = vmul.f32 %v1942_v11, %v2217_v0  ;;  %v1840_v15 = vpop.f32.mrb[16].mxu1 }
 0x120   : > { %v1375_v16 = vmax.f32 %v1343_v12, 0.0  ;;  %v1306_v17 = vmul.f32 %v1943_v60, %v2217_v0  ;;  %v1892_v18 = vpop.f32.mrb[16].mxu0  ;;  %v816_v19 = vpop.f32.mrb[17].mxu1 }
 0x121   : > { %1408 = vst [vmem:[%s2230_s16 + $0x68] sm:$0xff] %v1376_v13  ;;  %v1346_v61 = vadd.f32 %v2222_v3, %v1307_v14  ;;  %v1944_v20 = vadd.f32 %v1892_v18, %v1840_v15  ;;  %v1174_v21 = vpop.f32.mrb[17].mxu0 }
 0x122   : > { %1407 = vst [vmem:[%s2230_s16 + $0x60] sm:$0xff] %v1375_v16  ;;  %v1345_v22 = vadd.f32 %v2222_v3, %v1306_v17  ;;  %v1945_v62 = vadd.f32 %v1174_v21, %v816_v19 }
 0x123   : > { %v1378_v23 = vmax.f32 %v1346_v61, 0.0  ;;  %v1309_v24 = vmul.f32 %v1944_v20, %v2217_v0  ;;  %v1843_v25 = vpop.f32.mrb[18].mxu1 }
 0x124   : > { %v1377_v26 = vmax.f32 %v1345_v22, 0.0  ;;  %v1308_v27 = vmul.f32 %v1945_v62, %v2217_v0  ;;  %v1895_v28 = vpop.f32.mrb[18].mxu0  ;;  %v826_v29 = vpop.f32.mrb[19].mxu1 }
 0x125   : > { %1410 = vst [vmem:[%s2230_s16 + $0x78] sm:$0xff] %v1378_v23  ;;  %v1348_v30 = vadd.f32 %v2222_v3, %v1309_v24  ;;  %v1946_v31 = vadd.f32 %v1895_v28, %v1843_v25  ;;  %v1184_v32 = vpop.f32.mrb[19].mxu0 }
 0x126   : > { %1409 = vst [vmem:[%s2230_s16 + $0x70] sm:$0xff] %v1377_v26  ;;  %v1347_v33 = vadd.f32 %v2222_v3, %v1308_v27  ;;  %v1947_v34 = vadd.f32 %v1184_v32, %v826_v29 }
 0x127   : > { %v1380_v35 = vmax.f32 %v1348_v30, 0.0  ;;  %v1311_v36 = vmul.f32 %v1946_v31, %v2217_v0  ;;  %v1846_v37 = vpop.f32.mrb[20].mxu1 }
 0x128   : > { %v1379_v38 = vmax.f32 %v1347_v33, 0.0  ;;  %v1310_v39 = vmul.f32 %v1947_v34, %v2217_v0  ;;  %v1898_v40 = vpop.f32.mrb[20].mxu0  ;;  %v836_v41 = vpop.f32.mrb[21].mxu1 }
 0x129   : > { %1412 = vst [vmem:[%s2230_s16 + $0x88] sm:$0xff] %v1380_v35  ;;  %v1350_v42 = vadd.f32 %v2222_v3, %v1311_v36  ;;  %v1948_v43 = vadd.f32 %v1898_v40, %v1846_v37  ;;  %v1194_v44 = vpop.f32.mrb[21].mxu0 }
 0x12a   : > { %1411 = vst [vmem:[%s2230_s16 + $0x80] sm:$0xff] %v1379_v38  ;;  %v1349_v45 = vadd.f32 %v2222_v3, %v1310_v39  ;;  %v1949_v46 = vadd.f32 %v1194_v44, %v836_v41 }
 0x12b   : > { %v1382_v47 = vmax.f32 %v1350_v42, 0.0  ;;  %v1313_v48 = vmul.f32 %v1948_v43, %v2217_v0  ;;  %v1849_v49 = vpop.f32.mrb[22].mxu1 }
 0x12c   : > { %v1381_v50 = vmax.f32 %v1349_v45, 0.0  ;;  %v1312_v51 = vmul.f32 %v1949_v46, %v2217_v0  ;;  %v1901_v52 = vpop.f32.mrb[22].mxu0  ;;  %v846_v53 = vpop.f32.mrb[23].mxu1 }
 0x12d   : > { %1414 = vst [vmem:[%s2230_s16 + $0x98] sm:$0xff] %v1382_v47  ;;  %v1352_v54 = vadd.f32 %v2222_v3, %v1313_v48  ;;  %v1950_v55 = vadd.f32 %v1901_v52, %v1849_v49  ;;  %v1204_v56 = vpop.f32.mrb[23].mxu0 }
 0x12e   : > { %1413 = vst [vmem:[%s2230_s16 + $0x90] sm:$0xff] %v1381_v50  ;;  %v1351_v63 = vadd.f32 %v2222_v3, %v1312_v51  ;;  %v1951_v1 = vadd.f32 %v1204_v56, %v846_v53 }
 0x12f   : > { %v1384_v57 = vmax.f32 %v1352_v54, 0.0  ;;  %v1315_v2 = vmul.f32 %v1950_v55, %v2217_v0  ;;  %v1852_v4 = vpop.f32.mrb[24].mxu1 }
 0x130   : > { %v1383_v58 = vmax.f32 %v1351_v63, 0.0  ;;  %v1314_v5 = vmul.f32 %v1951_v1, %v2217_v0  ;;  %v1904_v6 = vpop.f32.mrb[24].mxu0  ;;  %v856_v7 = vpop.f32.mrb[25].mxu1 }
 0x131   : > { %1416 = vst [vmem:[%s2230_s16 + $0xa8] sm:$0xff] %v1384_v57  ;;  %v1354_v8 = vadd.f32 %v2222_v3, %v1315_v2  ;;  %v1952_v9 = vadd.f32 %v1904_v6, %v1852_v4  ;;  %v1214_v10 = vpop.f32.mrb[25].mxu0 }
 0x132   : > { %1415 = vst [vmem:[%s2230_s16 + $0xa0] sm:$0xff] %v1383_v58  ;;  %v1353_v11 = vadd.f32 %v2222_v3, %v1314_v5  ;;  %v1953_v59 = vadd.f32 %v1214_v10, %v856_v7 }
 0x133   : > { %v1386_v12 = vmax.f32 %v1354_v8, 0.0  ;;  %v1317_v60 = vmul.f32 %v1952_v9, %v2217_v0  ;;  %v1855_v13 = vpop.f32.mrb[26].mxu1 }
 0x134   : > { %v1385_v14 = vmax.f32 %v1353_v11, 0.0  ;;  %v1316_v15 = vmul.f32 %v1953_v59, %v2217_v0  ;;  %v1907_v16 = vpop.f32.mrb[26].mxu0  ;;  %v866_v17 = vpop.f32.mrb[27].mxu1 }
 0x135   : > { %1418 = vst [vmem:[%s2230_s16 + $0xb8] sm:$0xff] %v1386_v12  ;;  %v1356_v18 = vadd.f32 %v2222_v3, %v1317_v60  ;;  %v1954_v19 = vadd.f32 %v1907_v16, %v1855_v13  ;;  %v1224_v61 = vpop.f32.mrb[27].mxu0 }
 0x136   : > { %1417 = vst [vmem:[%s2230_s16 + $0xb0] sm:$0xff] %v1385_v14  ;;  %v1355_v20 = vadd.f32 %v2222_v3, %v1316_v15  ;;  %v1955_v21 = vadd.f32 %v1224_v61, %v866_v17 }
 0x137   : > { %v1388_v22 = vmax.f32 %v1356_v18, 0.0  ;;  %v1319_v62 = vmul.f32 %v1954_v19, %v2217_v0  ;;  %v1858_v23 = vpop.f32.mrb[28].mxu1 }
 0x138   : > { %v1387_v24 = vmax.f32 %v1355_v20, 0.0  ;;  %v1318_v25 = vmul.f32 %v1955_v21, %v2217_v0  ;;  %v1910_v26 = vpop.f32.mrb[28].mxu0  ;;  %v876_v27 = vpop.f32.mrb[29].mxu1 }
 0x139   : > { %1420 = vst [vmem:[%s2230_s16 + $0xc8] sm:$0xff] %v1388_v22  ;;  %v1358_v28 = vadd.f32 %v2222_v3, %v1319_v62  ;;  %v1956_v29 = vadd.f32 %v1910_v26, %v1858_v23  ;;  %v1234_v30 = vpop.f32.mrb[29].mxu0 }
 0x13a   : > { %1419 = vst [vmem:[%s2230_s16 + $0xc0] sm:$0xff] %v1387_v24  ;;  %v1357_v31 = vadd.f32 %v2222_v3, %v1318_v25  ;;  %v1957_v32 = vadd.f32 %v1234_v30, %v876_v27 }
 0x13b   : > { %v1390_v33 = vmax.f32 %v1358_v28, 0.0  ;;  %v1321_v34 = vmul.f32 %v1956_v29, %v2217_v0  ;;  %v1861_v35 = vpop.f32.mrb[30].mxu1 }
 0x13c   : > { %v1389_v36 = vmax.f32 %v1357_v31, 0.0  ;;  %v1320_v37 = vmul.f32 %v1957_v32, %v2217_v0  ;;  %v1913_v38 = vpop.f32.mrb[30].mxu0  ;;  %v886_v39 = vpop.f32.mrb[31].mxu1 }
 0x13d   : > { %1422 = vst [vmem:[%s2230_s16 + $0xd8] sm:$0xff] %v1390_v33  ;;  %v1360_v40 = vadd.f32 %v2222_v3, %v1321_v34  ;;  %v1958_v41 = vadd.f32 %v1913_v38, %v1861_v35  ;;  %v1244_v42 = vpop.f32.mrb[31].mxu0 }
 0x13e   : > { %1421 = vst [vmem:[%s2230_s16 + $0xd0] sm:$0xff] %v1389_v36  ;;  %v1359_v43 = vadd.f32 %v2222_v3, %v1320_v37  ;;  %v1959_v44 = vadd.f32 %v1244_v42, %v886_v39 }
 0x13f   : > { %v1392_v45 = vmax.f32 %v1360_v40, 0.0  ;;  %v1323_v46 = vmul.f32 %v1958_v41, %v2217_v0 }
 0x140   : > { %v1391_v47 = vmax.f32 %v1359_v43, 0.0  ;;  %v1322_v48 = vmul.f32 %v1959_v44, %v2217_v0 }
 0x141   : > { %1424 = vst [vmem:[%s2230_s16 + $0xe8] sm:$0xff] %v1392_v45  ;;  %v1362_v49 = vadd.f32 %v2222_v3, %v1323_v46 }
 0x142   : > { %1423 = vst [vmem:[%s2230_s16 + $0xe0] sm:$0xff] %v1391_v47  ;;  %v1361_v50 = vadd.f32 %v2222_v3, %v1322_v48 }
 0x143   : > { %v1394_v51 = vmax.f32 %v1362_v49, 0.0 }
 0x144   : > { %v1393_v52 = vmax.f32 %v1361_v50, 0.0 }
 0x145   : > { %1426 = vst [vmem:[%s2230_s16 + $0xf8] sm:$0xff] %v1394_v51 }
 0x146   : > { %1425 = vst [vmem:[%s2230_s16 + $0xf0] sm:$0xff] %v1393_v52 }
 0x147 PF: > { %s14_s15 = sadd.s32 1, %s2006_s15  }
 0x148   : > { %p11_p4 = scmp.ge.s32.totalorder %s14_s15, 6  }
 0x14a   :  { %13 = sbr.rel (!%p11_p4) target bundleno = 1 (0x1), region = 68 }

</bundles_post_ra>
